<compile_context>
chip_gen: v6e
topology: v6e:2x2x1
jax: 0.10.0
libtpu: 0.0.40
codegen_flags: <defaults>
</compile_context>

<pallas_src>
import jax
import jax.numpy as jnp
from jax.experimental import pallas as pl
from jax.experimental.pallas import tpu as pltpu

LANES = 128                 # vreg lane width (last dim)
SUBLANES = 8                # f32 sublane count (second-to-last dim)
ALIGN = SUBLANES * LANES    # 1024 elements = one (8, 128) f32 tile
MAX_TILE_ROWS = 4096        # 4096 * 128 * 4 B = 2 MiB per VMEM buffer
SMALL_N = 1 << 17           # below this, a fused jnp op beats a pallas_call


def _round_up(a: int, b: int) -> int:
    return (a + b - 1) // b * b


def _fma_kernel(wb_ref, x_ref, o_ref):
    # wb_ref lives in SMEM: wb_ref[0] = weight scalar, wb_ref[1] = bias scalar.
    # Pure VPU: elementwise FMA on a lane-dense (tile_rows, 128) block.
    o_ref[...] = x_ref[...] * wb_ref[0] + wb_ref[1]


def linear_forward(x, weight, bias, *, small_n_threshold=SMALL_N):
    """y = x @ weight^T + bias, matching torch.nn.Linear(1, 1) semantics.

    x: (N, 1) float32, weight: (1, 1) (PyTorch convention), bias: (1,).
    """
    n, in_f = x.shape
    out_f = weight.shape[0]
    assert in_f == 1 and out_f == 1, "kernel specialized for Linear(1, 1)"

    w = weight.reshape(()).astype(jnp.float32)
    b = bias.reshape(()).astype(jnp.float32)

    # ---- Small-N fast path: dispatch/layout overhead dominates; one fused
    # XLA elementwise op has none of it. ----
    if n < small_n_threshold:
        return (x.astype(jnp.float32) * w + b).astype(x.dtype)

    # Scalars for SMEM: [w, b].
    wb = jnp.stack([w, b])

    # ---- Lane-dense layout: flatten (bitcast) and pad only to the next
    # (8,128)-tile boundary (<= 1023 extra elements). ----
    flat = x.reshape(-1).astype(jnp.float32)
    padded_n = _round_up(n, ALIGN)
    if padded_n != n:
        flat = jnp.pad(flat, (0, padded_n - n))    # fused into input DMA below
    rows = padded_n // LANES                        # multiple of 8
    x2d = flat.reshape(rows, LANES)                 # bitcast, no copy

    # Tile rows: up to 2 MiB/buffer, multiple of 8, and small enough that
    # large inputs get >= 2 grid steps (keeps both v7x TensorCores busy).
    tile_rows = min(
        MAX_TILE_ROWS,
        rows,
        max(SUBLANES, _round_up(pl.cdiv(rows, 2), SUBLANES)),
    )
    grid = (pl.cdiv(rows, tile_rows),)   # last block may overhang; Pallas masks it

    cost = pl.CostEstimate(
        flops=2 * padded_n,
        transcendentals=0,
        bytes_accessed=8 * padded_n + 8,  # read x + write y + (w, b)
    )

    y2d = pl.pallas_call(
        _fma_kernel,
        out_shape=jax.ShapeDtypeStruct((rows, LANES), jnp.float32),
        grid=grid,
        in_specs=[
            # weight/bias scalars -> SMEM, whole (untiled) array.
            pl.BlockSpec(memory_space=pltpu.MemorySpace.SMEM),
            # lane-dense input tile, one row-tile per grid step.
            pl.BlockSpec((tile_rows, LANES), lambda i: (i, 0)),
        ],
        out_specs=pl.BlockSpec((tile_rows, LANES), lambda i: (i, 0)),
        compiler_params=pltpu.CompilerParams(
            dimension_semantics=("parallel",),
            # Let XLA fuse the pad/convert producer into the Pallas input DMA
            # instead of materializing a separate HBM pass.
            allow_input_fusion=[False, True],
        ),
        cost_estimate=cost,
    )(wb, x2d)

    # Undo layout change; the tail slice (extra pass) only happens for ragged n.
    y_flat = y2d.reshape(-1)                        # bitcast
    if padded_n != n:
        y_flat = y_flat[:n]
    return y_flat.reshape(n, out_f).astype(x.dtype)


if __name__ == "__main__":
    key = jax.random.PRNGKey(0)
    k_x, k_w, k_b = jax.random.split(key, 3)

    # Module shapes: Linear(1, 1) -> weight (1, 1), bias (1,). Input (N, 1).
    N, IN_F, OUT_F = 8, 1, 1

    x = jax.random.normal(k_x, (N, IN_F), dtype=jnp.float32)
    # Deterministic init mimicking torch.nn.Linear's U(-1/sqrt(in), 1/sqrt(in))
    bound = 1.0 / jnp.sqrt(jnp.float32(IN_F))
    weight = jax.random.uniform(k_w, (OUT_F, IN_F), jnp.float32, -bound, bound)
    bias = jax.random.uniform(k_b, (OUT_F,), jnp.float32, -bound, bound)

    y_ref = x @ weight.T + bias

    # 1) Default path (small-N fast path, no Pallas dispatch overhead).
    y_fast = linear_forward(x, weight, bias)
    jax.block_until_ready(y_fast)
    assert y_fast.shape == (N, OUT_F)
    assert jnp.allclose(y_fast, y_ref, atol=1e-5, rtol=1e-5)

    # 2) Force the Pallas kernel at the same small shape (single-tile grid).
    y_pk = linear_forward(x, weight, bias, small_n_threshold=0)
    jax.block_until_ready(y_pk)
    assert y_pk.shape == (N, OUT_F)
    assert jnp.allclose(y_pk, y_ref, atol=1e-5, rtol=1e-5)

    # 3) Modest ragged size exercising the multi-step "parallel" grid and the
    #    overhanging last block (n not a multiple of 128, rows not a multiple
    #    of tile_rows).
    N2 = 33_000
    x2 = jax.random.normal(k_x, (N2, IN_F), dtype=jnp.float32)
    y2 = linear_forward(x2, weight, bias, small_n_threshold=0)
    jax.block_until_ready(y2)
    y2_ref = x2 @ weight.T + bias
    assert y2.shape == (N2, OUT_F)
    assert jnp.allclose(y2, y2_ref, atol=1e-5, rtol=1e-5)

    print("KERNEL_OK")
</pallas_src>

<mosaic_0001>
module attributes {stable_mosaic.version = 11 : i64} {
  func.func @_fma_kernel(%arg0: i32, %arg1: memref<2xf32, #tpu.memory_space<smem>>, %arg2: memref<8x128xf32, #tpu.memory_space<vmem>>, %arg3: memref<8x128xf32, #tpu.memory_space<vmem>>) attributes {dimension_semantics = [#tpu.dimension_semantics<parallel>], iteration_bounds = array<i64: 1>, scalar_prefetch = 0 : i64, scratch_operands = 0 : i64, tpu.core_type = #tpu.core_type<tc>, window_params = [{transform_indices = @transform_0, window_bounds = array<i64: 2>}, {transform_indices = @transform_1, window_bounds = array<i64: 8, 128>}, {transform_indices = @transform_2, window_bounds = array<i64: 8, 128>}]} {
    %c0 = arith.constant 0 : index
    %c0_0 = arith.constant 0 : index
    %0 = vector.load %arg2[%c0, %c0_0] : memref<8x128xf32, #tpu.memory_space<vmem>>, vector<8x128xf32>
    %c0_1 = arith.constant 0 : index
    %1 = memref.load %arg1[%c0_1] : memref<2xf32, #tpu.memory_space<smem>>
    %2 = vector.broadcast %1 : f32 to vector<8x128xf32>
    %3 = arith.mulf %0, %2 : vector<8x128xf32>
    %c1 = arith.constant 1 : index
    %4 = memref.load %arg1[%c1] : memref<2xf32, #tpu.memory_space<smem>>
    %5 = vector.broadcast %4 : f32 to vector<8x128xf32>
    %6 = arith.addf %3, %5 : vector<8x128xf32>
    %c0_2 = arith.constant 0 : index
    %c0_3 = arith.constant 0 : index
    %7 = vector.load %arg3[%c0_2, %c0_3] : memref<8x128xf32, #tpu.memory_space<vmem>>, vector<8x128xf32>
    tpu.vector_store %arg3[%c0_2, %c0_3], %6 {strides = array<i32>} : memref<8x128xf32, #tpu.memory_space<vmem>>, vector<8x128xf32>,
    return
  }
  func.func @transform_0(%arg0: i32) -> i32 {
    %c0_i32 = arith.constant 0 : i32
    %c0_i32_0 = arith.constant 0 : i32
    return %c0_i32 : i32
  }
  func.func @transform_1(%arg0: i32) -> (i32, i32) {
    %c0_i32 = arith.constant 0 : i32
    %c0_i32_0 = arith.constant 0 : i32
    return %arg0, %c0_i32 : i32, i32
  }
  func.func @transform_2(%arg0: i32) -> (i32, i32) {
    %c0_i32 = arith.constant 0 : i32
    %c0_i32_0 = arith.constant 0 : i32
    return %arg0, %c0_i32 : i32, i32
  }
}

</mosaic_0001>

<bundles_post_ra>
// kernel: tpu_custom_call.1
= control target key start
LH: loop header
LB: loop body
LE: loop exit
PB: predicated region body
PF: predicated region fallthrough
CT: control target
= control target key end

     0   :  { %7 = vsyncpa [#allocation5], 0  ;;  %s144_s0 = inlined_call_operand.hbm [shape: f32[2], index: 0, kind: input, shape index: {}]   ;;  %s145_s1 = inlined_call_operand.hbm [shape: f32[8,128], index: 1, kind: input, shape index: {}]   ;;  %s146_s2 = inlined_call_operand.hbm [shape: f32[8,128], index: 2, kind: output, shape index: {}]  }
   0x1   :  { %8 = vsyncpa [#allocation3], 0 }
   0x2   :  { %9 = vsyncpa [#allocation4], 0  ;;  %s117_s9 = smov [#allocation2]   ;;  %s118_s12 = smov [#allocation6]  }
   0x3   :  { %17 = dma.hbm_to_smem %s144_s0, 16, %s117_s9, [#allocation5]  }
   0x4   :  { %s24_s13 = sshll.u32 %s118_s12, 4  ;;  %s25_s13 = int_to_ptr.vmem [resolvable:$true] %s24_s13 }
   0x5   :  { %s79_s14 = scalar_lea.vmem %s25_s13, 128  ;;  %p84_p1 = scmp.lt.s32.totalorder %s25_s13, %s25_s13 }
   0x6   :  { %p80_p0 = scmp.ne.s32.totalorder %s25_s13, %s79_s14  ;;  %p85_p2 = scmp.lt.s32.totalorder %s79_s14, %s79_s14 }
   0x8   :  { %p86_p3 = por %p85_p2, %p84_p1 }
   0xa   :  { %p87_p4 = pnand %p86_p3, %p80_p0 }
   0xc   :  { %90 = shalt.err (!%p87_p4)
}
   0xd   :  { %27 = dma.hbm_to_vmem [thread:$0]  %s145_s1, 128, %s25_s13, [#allocation3]  }
   0xe   :  { %111 = dma.done.wait [#allocation5], 16  }
   0xf   :  { %112 = vsyncadd [#allocation5], 4294967280 }
  0x10   :  { %113 = dma.done.wait [#allocation3], 128  }
  0x11   :  { %114 = vsyncadd [#allocation3], 4294967168 }
  0x12   :  { %34 = sfence }
  0x13   :  { %s36_s0 = sld [smem:[#allocation2]]  ;;  %v35_v0 = vld [vmem:[#allocation6] sm:$0xff]  ;;  %s119_s18 = smov [#allocation7]  }
  0x14   :  { %s59_s17 = sld [smem:[#allocation2 + $0x1]]  ;;  %s49_s19 = sshll.u32 %s119_s18, 4  ;;  %s50_s19 = int_to_ptr.vmem [resolvable:$true] %s49_s19 }
  0x15   :  { %s91_s20 = scalar_lea.vmem %s50_s19, 128  ;;  %p96_p6 = scmp.lt.s32.totalorder %s50_s19, %s50_s19 }
  0x16   :  { %p92_p5 = scmp.ne.s32.totalorder %s50_s19, %s91_s20  ;;  %p97_p7 = scmp.lt.s32.totalorder %s91_s20, %s91_s20 }
  0x18   :  { %p98_p8 = por %p97_p7, %p96_p6 }
  0x19   :  { %v37_v1 = vstv %s36_s0 }
  0x1a   :  { %v38_v2 = vmul.f32 %v37_v1, %v35_v0  ;;  %v40_v3 = vstv %s59_s17  ;;  %p99_p9 = pnand %p98_p8, %p92_p5 }
  0x1c   :  { %v41_v4 = vadd.f32 %v40_v3, %v38_v2 }
  0x1e   :  { %42 = vst [vmem:[#allocation7] sm:$0xff] %v41_v4 }
  0x1f   :  { %102 = shalt.err (!%p99_p9)
}
  0x20   :  { %52 = dma.vmem_to_hbm [thread:$0]  %s50_s19, 128, %s146_s2, [#allocation4]  }
  0x21   :  { %115 = dma.done.wait [#allocation4], 128  }
  0x22   :  { %116 = vsyncadd [#allocation4], 4294967168 }
  0x23   :  { %56 = vsyncpa [#allocation3], 1 }
  0x24   :  { %57 = vsyncpa [#allocation4], 1 }
  0x25   :  { %58 = vsyncpa [#allocation5], 1 }

</bundles_post_ra>
